<compile_context>
chip_gen: v7x
topology: tpu7x:2x2x1
jax: 0.10.0
libtpu: 0.0.40
codegen_flags: <defaults>
</compile_context>

<pallas_src>
import jax
import jax.numpy as jnp
from jax import lax
from jax.experimental import pallas as pl
from jax.experimental.pallas import tpu as pltpu


LANE_CHUNK = 1024   # batch lanes per inner step (bounds vreg live ranges)
TILE_CHUNKS = 4     # lane-chunks per grid step (amortizes per-step overhead)


def make_mlp_kernel(num_layers, n_chunks, chunk_b):
    """Fused MLP kernel.

    Kernel args: (x_ref, w0, b0, w1, b1, ..., out_ref)
      x_ref : (tile_b, d_in)   -- native layout
      w_i   : (out_f, in_f)    -- native PyTorch Linear layout
      b_i   : (out_f, 1)       -- column bias, broadcasts across lanes
      out   : (tile_b, d_out)  -- native layout
    """

    def kernel(x_ref, *refs):
        out_ref = refs[-1]
        params = refs[:-1]
        # Params are tiny (< a few vregs total); load once, keep live.
        ws = [params[2 * i][...] for i in range(num_layers)]
        bs = [params[2 * i + 1][...] for i in range(num_layers)]

        def compute_chunk(row0):
            x = x_ref[pl.ds(row0, chunk_b), :]            # (chunk_b, d_in)
            # First layer: contract over d_in without materializing x^T.
            # (out_f, in_f) . (chunk_b, in_f)^T -> (out_f, chunk_b): batch on lanes.
            h = lax.dot_general(ws[0], x, (((1,), (1,)), ((), ())),
                                preferred_element_type=jnp.float32) + bs[0]
            if num_layers > 1:
                h = jnp.maximum(h, 0.0)
            for i in range(1, num_layers):
                h = jnp.dot(ws[i], h, preferred_element_type=jnp.float32) + bs[i]
                if i < num_layers - 1:
                    h = jnp.maximum(h, 0.0)
            # h: (d_out, chunk_b) -> store in native (batch, feature) layout.
            out_ref[pl.ds(row0, chunk_b), :] = h.T.astype(out_ref.dtype)

        if n_chunks == 1:
            compute_chunk(0)
        else:
            def body(c, carry):
                compute_chunk(pl.multiple_of(c * chunk_b, chunk_b))
                return carry
            lax.fori_loop(0, n_chunks, body, 0)

    return kernel


def custom_net_forward(x, weights, biases):
    """Run the fused MLP Pallas kernel.

    x:       (B, layers[0]) float32
    weights: list of (layers[i+1], layers[i]) float32   (PyTorch layout)
    biases:  list of (layers[i+1],)           float32
    Returns: (B, layers[-1]) float32
    """
    num_layers = len(weights)
    batch, d_in = x.shape
    d_out = weights[-1].shape[0]

    # ---- batch tiling -------------------------------------------------------
    if batch <= LANE_CHUNK:
        # Whole small batch in one grid step, one chunk: no padding, no
        # per-step pipeline overhead beyond the single launch.
        tile_b, chunk_b, n_tiles, padded_b = batch, batch, 1, batch
    else:
        chunk_b = LANE_CHUNK
        total_chunks = pl.cdiv(batch, chunk_b)
        n_tiles = pl.cdiv(total_chunks, TILE_CHUNKS)
        if total_chunks >= 4:
            n_tiles = max(n_tiles, 2)        # use both TCs on v7x
        chunks_per_tile = pl.cdiv(total_chunks, n_tiles)
        tile_b = chunks_per_tile * chunk_b
        padded_b = n_tiles * tile_b

    if padded_b != batch:
        x = jnp.pad(x, ((0, padded_b - batch), (0, 0)))

    # ---- specs --------------------------------------------------------------
    in_specs = [pl.BlockSpec((tile_b, d_in), lambda i: (i, 0))]
    flat_params = []
    for w, b in zip(weights, biases):
        b_col = b.reshape(w.shape[0], 1)
        in_specs.append(pl.BlockSpec(w.shape, lambda i: (0, 0)))
        in_specs.append(pl.BlockSpec(b_col.shape, lambda i: (0, 0)))
        flat_params += [w, b_col]
    out_spec = pl.BlockSpec((tile_b, d_out), lambda i: (i, 0))

    kernel = make_mlp_kernel(num_layers, tile_b // chunk_b, chunk_b)

    out = pl.pallas_call(
        kernel,
        out_shape=jax.ShapeDtypeStruct((padded_b, d_out), jnp.float32),
        grid_spec=pltpu.PrefetchScalarGridSpec(
            num_scalar_prefetch=0,
            grid=(n_tiles,),
            in_specs=in_specs,
            out_specs=out_spec,
        ),
        compiler_params=pltpu.CompilerParams(
            dimension_semantics=("parallel",),   # batch tiles shard across TCs
        ),
    )(x, *flat_params)

    return out[:batch] if padded_b != batch else out


def init_params(layers, key):
    """PyTorch-Linear-style init: U(-1/sqrt(fan_in), 1/sqrt(fan_in))."""
    weights, biases = [], []
    for i in range(len(layers) - 1):
        fan_in, fan_out = layers[i], layers[i + 1]
        key, kw, kb = jax.random.split(key, 3)
        bound = 1.0 / jnp.sqrt(jnp.float32(fan_in))
        weights.append(jax.random.uniform(kw, (fan_out, fan_in), jnp.float32,
                                          -bound, bound))
        biases.append(jax.random.uniform(kb, (fan_out,), jnp.float32,
                                         -bound, bound))
    return weights, biases


def reference_forward(x, weights, biases):
    """Pure-JAX reference matching PyTorch semantics: x @ W^T + b."""
    h = x
    for i, (w, b) in enumerate(zip(weights, biases)):
        h = h @ w.T + b
        if i < len(weights) - 1:
            h = jnp.maximum(h, 0.0)
    return h


if __name__ == "__main__":
    # DeepONet-style trunk/branch MLP: layers = [16, 32, 32, 8]
    layers = [16, 32, 32, 8]
    key = jax.random.PRNGKey(0)
    key, kp = jax.random.split(key)
    weights, biases = init_params(layers, kp)

    run = jax.jit(custom_net_forward)

    # Small batch: single grid step, single lane-chunk, no padding.
    key, kx = jax.random.split(key)
    x_small = jax.random.normal(kx, (256, layers[0]), dtype=jnp.float32)
    out_small = jax.block_until_ready(run(x_small, weights, biases))
    ref_small = reference_forward(x_small, weights, biases)
    assert out_small.shape == (256, layers[-1])
    assert jnp.allclose(out_small, ref_small, atol=1e-4, rtol=1e-5), "mismatch (small)"

    # Larger non-aligned batch: exercises padding + in-kernel lane-chunk loop.
    key, kx = jax.random.split(key)
    x_big = jax.random.normal(kx, (2176, layers[0]), dtype=jnp.float32)
    out_big = jax.block_until_ready(run(x_big, weights, biases))
    ref_big = reference_forward(x_big, weights, biases)
    assert out_big.shape == (2176, layers[-1])
    assert jnp.allclose(out_big, ref_big, atol=1e-4, rtol=1e-5), "mismatch (big)"

    print("KERNEL_OK")
</pallas_src>

<mosaic_0001>
module attributes {stable_mosaic.version = 11 : i64} {
  func.func @kernel(%arg0: i32, %arg1: memref<256x16xf32, #tpu.memory_space<vmem>>, %arg2: memref<32x16xf32, #tpu.memory_space<vmem>>, %arg3: memref<32x1xf32, #tpu.memory_space<vmem>>, %arg4: memref<32x32xf32, #tpu.memory_space<vmem>>, %arg5: memref<32x1xf32, #tpu.memory_space<vmem>>, %arg6: memref<8x32xf32, #tpu.memory_space<vmem>>, %arg7: memref<8x1xf32, #tpu.memory_space<vmem>>, %arg8: memref<256x8xf32, #tpu.memory_space<vmem>>) attributes {dimension_semantics = [#tpu.dimension_semantics<parallel>], iteration_bounds = array<i64: 1>, scalar_prefetch = 0 : i64, scratch_operands = 0 : i64, tpu.core_type = #tpu.core_type<tc>, window_params = [{transform_indices = @transform_0, window_bounds = array<i64: 256, 16>}, {pipeline_mode = #tpu.pipeline_mode<synchronous>, transform_indices = @transform_1, window_bounds = array<i64: 32, 16>}, {pipeline_mode = #tpu.pipeline_mode<synchronous>, transform_indices = @transform_2, window_bounds = array<i64: 32, 1>}, {pipeline_mode = #tpu.pipeline_mode<synchronous>, transform_indices = @transform_3, window_bounds = array<i64: 32, 32>}, {pipeline_mode = #tpu.pipeline_mode<synchronous>, transform_indices = @transform_4, window_bounds = array<i64: 32, 1>}, {pipeline_mode = #tpu.pipeline_mode<synchronous>, transform_indices = @transform_5, window_bounds = array<i64: 8, 32>}, {pipeline_mode = #tpu.pipeline_mode<synchronous>, transform_indices = @transform_6, window_bounds = array<i64: 8, 1>}, {transform_indices = @transform_7, window_bounds = array<i64: 256, 8>}]} {
    %c0 = arith.constant 0 : index
    %c0_0 = arith.constant 0 : index
    %0 = vector.load %arg2[%c0, %c0_0] : memref<32x16xf32, #tpu.memory_space<vmem>>, vector<32x16xf32>
    %c0_1 = arith.constant 0 : index
    %c0_2 = arith.constant 0 : index
    %1 = vector.load %arg4[%c0_1, %c0_2] : memref<32x32xf32, #tpu.memory_space<vmem>>, vector<32x32xf32>
    %c0_3 = arith.constant 0 : index
    %c0_4 = arith.constant 0 : index
    %2 = vector.load %arg6[%c0_3, %c0_4] : memref<8x32xf32, #tpu.memory_space<vmem>>, vector<8x32xf32>
    %c0_5 = arith.constant 0 : index
    %c0_6 = arith.constant 0 : index
    %3 = vector.load %arg3[%c0_5, %c0_6] : memref<32x1xf32, #tpu.memory_space<vmem>>, vector<32x1xf32>
    %c0_7 = arith.constant 0 : index
    %c0_8 = arith.constant 0 : index
    %4 = vector.load %arg5[%c0_7, %c0_8] : memref<32x1xf32, #tpu.memory_space<vmem>>, vector<32x1xf32>
    %c0_9 = arith.constant 0 : index
    %c0_10 = arith.constant 0 : index
    %5 = vector.load %arg7[%c0_9, %c0_10] : memref<8x1xf32, #tpu.memory_space<vmem>>, vector<8x1xf32>
    %c0_11 = arith.constant 0 : index
    %c0_12 = arith.constant 0 : index
    %6 = vector.load %arg1[%c0_11, %c0_12] : memref<256x16xf32, #tpu.memory_space<vmem>>, vector<256x16xf32>
    %cst = arith.constant dense<0.000000e+00> : vector<32x256xf32>
    %7 = tpu.matmul %0, %6, %cst {dimension_numbers = #tpu.dot_dimension_numbers<[1], [1], [0], [0], [0, 0, 1, 0], [], []>} : vector<32x16xf32>, vector<256x16xf32>, vector<32x256xf32> -> vector<32x256xf32>
    %8 = vector.broadcast %3 : vector<32x1xf32> to vector<32x256xf32>
    %9 = arith.addf %7, %8 : vector<32x256xf32>
    %cst_13 = arith.constant 0.000000e+00 : f32
    %10 = vector.broadcast %cst_13 : f32 to vector<32x256xf32>
    %11 = arith.maximumf %9, %10 : vector<32x256xf32>
    %cst_14 = arith.constant dense<0.000000e+00> : vector<32x256xf32>
    %12 = tpu.matmul %1, %11, %cst_14 {dimension_numbers = #tpu.dot_dimension_numbers<[1], [0], [0], [1], [0, 0, 1, 1], [], []>} : vector<32x32xf32>, vector<32x256xf32>, vector<32x256xf32> -> vector<32x256xf32>
    %13 = vector.broadcast %4 : vector<32x1xf32> to vector<32x256xf32>
    %14 = arith.addf %12, %13 : vector<32x256xf32>
    %cst_15 = arith.constant 0.000000e+00 : f32
    %15 = vector.broadcast %cst_15 : f32 to vector<32x256xf32>
    %16 = arith.maximumf %14, %15 : vector<32x256xf32>
    %cst_16 = arith.constant dense<0.000000e+00> : vector<8x256xf32>
    %17 = tpu.matmul %2, %16, %cst_16 {dimension_numbers = #tpu.dot_dimension_numbers<[1], [0], [0], [1], [0, 0, 1, 1], [], []>} : vector<8x32xf32>, vector<32x256xf32>, vector<8x256xf32> -> vector<8x256xf32>
    %18 = vector.broadcast %5 : vector<8x1xf32> to vector<8x256xf32>
    %19 = arith.addf %17, %18 : vector<8x256xf32>
    %20 = tpu.transpose %19, [1, 0] : vector<8x256xf32> -> vector<256x8xf32>
    %c0_17 = arith.constant 0 : index
    %c0_18 = arith.constant 0 : index
    %21 = vector.load %arg8[%c0_17, %c0_18] : memref<256x8xf32, #tpu.memory_space<vmem>>, vector<256x8xf32>
    tpu.vector_store %arg8[%c0_17, %c0_18], %20 {strides = array<i32>} : memref<256x8xf32, #tpu.memory_space<vmem>>, vector<256x8xf32>,
    return
  }
  func.func @transform_0(%arg0: i32) -> (i32, i32) {
    %c0_i32 = arith.constant 0 : i32
    %c0_i32_0 = arith.constant 0 : i32
    return %arg0, %c0_i32 : i32, i32
  }
  func.func @transform_1(%arg0: i32) -> (i32, i32) {
    %c0_i32 = arith.constant 0 : i32
    %c0_i32_0 = arith.constant 0 : i32
    %c0_i32_1 = arith.constant 0 : i32
    return %c0_i32, %c0_i32_0 : i32, i32
  }
  func.func @transform_2(%arg0: i32) -> (i32, i32) {
    %c0_i32 = arith.constant 0 : i32
    %c0_i32_0 = arith.constant 0 : i32
    %c0_i32_1 = arith.constant 0 : i32
    return %c0_i32, %c0_i32_0 : i32, i32
  }
  func.func @transform_3(%arg0: i32) -> (i32, i32) {
    %c0_i32 = arith.constant 0 : i32
    %c0_i32_0 = arith.constant 0 : i32
    %c0_i32_1 = arith.constant 0 : i32
    return %c0_i32, %c0_i32_0 : i32, i32
  }
  func.func @transform_4(%arg0: i32) -> (i32, i32) {
    %c0_i32 = arith.constant 0 : i32
    %c0_i32_0 = arith.constant 0 : i32
    %c0_i32_1 = arith.constant 0 : i32
    return %c0_i32, %c0_i32_0 : i32, i32
  }
  func.func @transform_5(%arg0: i32) -> (i32, i32) {
    %c0_i32 = arith.constant 0 : i32
    %c0_i32_0 = arith.constant 0 : i32
    %c0_i32_1 = arith.constant 0 : i32
    return %c0_i32, %c0_i32_0 : i32, i32
  }
  func.func @transform_6(%arg0: i32) -> (i32, i32) {
    %c0_i32 = arith.constant 0 : i32
    %c0_i32_0 = arith.constant 0 : i32
    %c0_i32_1 = arith.constant 0 : i32
    return %c0_i32, %c0_i32_0 : i32, i32
  }
  func.func @transform_7(%arg0: i32) -> (i32, i32) {
    %c0_i32 = arith.constant 0 : i32
    %c0_i32_0 = arith.constant 0 : i32
    return %arg0, %c0_i32 : i32, i32
  }
}

</mosaic_0001>

<bundles_post_ra>
// kernel: custom_net_forward.1
= control target key start
LH: loop header
LB: loop body
LE: loop exit
PB: predicated region body
PF: predicated region fallthrough
CT: control target
= control target key end

     0   :  { %vm96_vm0 = vcmask 130048   ;;  %v761_v3 = vmov 0   ;;  %v762_v63 = vmov 0.0   ;;  %vm322_vm2 = vcmask 261120   ;;  %s1136_s0 = inlined_call_operand.vmem [shape: f32[256,16], index: 0, kind: input, shape index: {}]   ;;  %s1137_s1 = inlined_call_operand.vmem [shape: f32[32,16], index: 1, kind: input, shape index: {}]   ;;  %s1138_s2 = inlined_call_operand.vmem [shape: f32[32,1], index: 2, kind: input, shape index: {}]   ;;  %s1139_s4 = inlined_call_operand.vmem [shape: f32[32,1], index: 4, kind: input, shape index: {}]   ;;  %s1140_s6 = inlined_call_operand.vmem [shape: f32[8,1], index: 6, kind: input, shape index: {}]   ;;  %s1141_s3 = inlined_call_operand.vmem [shape: f32[32,32], index: 3, kind: input, shape index: {}]   ;;  %s1142_s5 = inlined_call_operand.vmem [shape: f32[8,32], index: 5, kind: input, shape index: {}]   ;;  %s1143_s7 = inlined_call_operand.vmem [shape: f32[256,8], index: 7, kind: output, shape index: {}]  }
   0x1   :  { %v60_v0 = vld [vmem:[%s1136_s0 + $0x80] sm:$0xff]  ;;  %v61_v1 = vld [vmem:[%s1136_s0 + $0x88] sm:$0xff]  ;;  %vm811_vm1 = vmpackc.low %vm96_vm0, %vm96_vm0  ;;  %759 = vset.pattern.permute.xlu0 %v761_v3  ;;  %760 = vset.pattern.permute.xlu1 %v761_v3  ;;  %vm575_vm3 = vcmask 64512  }
   0x2   :  { %v693_v4 = vpack.c.bf16 %v61_v1, %v60_v0  ;;  %v44_v5 = vld [vmem:[%s1136_s0] sm:$0xff]  ;;  %v45_v6 = vld [vmem:[%s1136_s0 + $0x8] sm:$0xff]  ;;  %v62_v7 = vld [vmem:[%s1136_s0 + $0x90] sm:$0xff]  ;;  %399 = vmatprep.mubr.f32.mxu1 %v762_v63 }
   0x3   :  { %v696_v8 = vpack.c.bf16 %v45_v6, %v44_v5  ;;  %v63_v9 = vld [vmem:[%s1136_s0 + $0x98] sm:$0xff]  ;;  %v46_v11 = vld [vmem:[%s1136_s0 + $0x10] sm:$0xff]  ;;  %v64_v13 = vld [vmem:[%s1136_s0 + $0xa0] sm:$0xff] }
   0x4   :  { %695 = vmatprep.subr.msk.bf16.mxu0 %vm811_vm1, %v693_v4  ;;  %v699_v10 = vpack.c.bf16 %v63_v9, %v62_v7  ;;  %v47_v12 = vld [vmem:[%s1136_s0 + $0x18] sm:$0xff]  ;;  %v65_v14 = vld [vmem:[%s1136_s0 + $0xa8] sm:$0xff]  ;;  %v848_v17 = vld [vmem:[%s1137_s1] sm:$0xff] }
   0x5   :  { %698 = vmatpush3.bf16.xpose.msk.msra.mxu0 %vm811_vm1, %v696_v8  ;;  %v702_v15 = vpack.c.bf16 %v47_v12, %v46_v11  ;;  %v705_v16 = vpack.c.bf16 %v65_v14, %v64_v13  ;;  %685 = vmatprep.mubr.msk.f32.mxu0 %vm96_vm0, %v848_v17  ;;  %v35_v18 = vld [vmem:[%s1138_s2] sm:$0xff]  ;;  %v49_v20 = vld [vmem:[%s1136_s0 + $0x28] sm:$0xff]  ;;  %v37_v21 = vld [vmem:[%s1138_s2 + $0x10] sm:$0xff] }
   0x6   :  { %701 = vmatprep.subr.msk.bf16.mxu0 %vm811_vm1, %v699_v10  ;;  %v48_v19 = vld [vmem:[%s1136_s0 + $0x20] sm:$0xff]  ;;  %78 = vperm.xlu0 %759, %v35_v18   ;;  %v66_v22 = vld [vmem:[%s1136_s0 + $0xb0] sm:$0xff]  ;;  %v67_v23 = vld [vmem:[%s1136_s0 + $0xb8] sm:$0xff] }
   0x7   :  { %v36_v24 = vld [vmem:[%s1138_s2 + $0x8] sm:$0xff]  ;;  %88 = vperm.xlu1 %760, %v37_v21   ;;  %v38_v25 = vld [vmem:[%s1138_s2 + $0x18] sm:$0xff]  ;;  %v708_v26 = vpack.c.bf16 %v49_v20, %v48_v19  ;;  %v711_v27 = vpack.c.bf16 %v67_v23, %v66_v22  ;;  %v39_v28 = vld [vmem:[%s1139_s4] sm:$0xff] }
   0x8   :  { %v40_v29 = vld [vmem:[%s1139_s4 + $0x8] sm:$0xff]  ;;  %v50_v30 = vld [vmem:[%s1136_s0 + $0x30] sm:$0xff]  ;;  %v51_v31 = vld [vmem:[%s1136_s0 + $0x38] sm:$0xff] }
   0x9   :  { %v68_v32 = vld [vmem:[%s1136_s0 + $0xc0] sm:$0xff]  ;;  %v69_v33 = vld [vmem:[%s1136_s0 + $0xc8] sm:$0xff]  ;;  %v41_v34 = vld [vmem:[%s1139_s4 + $0x10] sm:$0xff]  ;;  %v714_v36 = vpack.c.bf16 %v51_v31, %v50_v30 }
   0xa   :  { %83 = vperm.xlu0 %759, %v36_v24   ;;  %v42_v35 = vld [vmem:[%s1139_s4 + $0x18] sm:$0xff]  ;;  %v717_v37 = vpack.c.bf16 %v69_v33, %v68_v32  ;;  %v43_v38 = vld [vmem:[%s1140_s6] sm:$0xff]  ;;  %v53_v40 = vld [vmem:[%s1136_s0 + $0x48] sm:$0xff] }
   0xb   :  { %93 = vperm.xlu1 %760, %v38_v25   ;;  %v52_v39 = vld [vmem:[%s1136_s0 + $0x40] sm:$0xff]  ;;  %v70_v41 = vld [vmem:[%s1136_s0 + $0xd0] sm:$0xff]  ;;  %v71_v42 = vld [vmem:[%s1136_s0 + $0xd8] sm:$0xff] }
   0xc   :  { %v720_v43 = vpack.c.bf16 %v53_v40, %v52_v39  ;;  %v723_v44 = vpack.c.bf16 %v71_v42, %v70_v41  ;;  %v54_v45 = vld [vmem:[%s1136_s0 + $0x50] sm:$0xff]  ;;  %v55_v46 = vld [vmem:[%s1136_s0 + $0x58] sm:$0xff]  ;;  %v72_v47 = vld [vmem:[%s1136_s0 + $0xe0] sm:$0xff] }
   0xd   :  { %704 = vmatpush3.bf16.xpose.msk.msra.mxu0 %vm811_vm1, %v702_v15  ;;  %v73_v48 = vld [vmem:[%s1136_s0 + $0xe8] sm:$0xff]  ;;  %v726_v49 = vpack.c.bf16 %v55_v46, %v54_v45  ;;  %v56_v51 = vld [vmem:[%s1136_s0 + $0x60] sm:$0xff]  ;;  %v74_v53 = vld [vmem:[%s1136_s0 + $0xf0] sm:$0xff] }
   0xe   :  { %707 = vmatprep.subr.msk.bf16.mxu0 %vm811_vm1, %v705_v16  ;;  %304 = vperm.xlu0 %759, %v39_v28   ;;  %v729_v50 = vpack.c.bf16 %v73_v48, %v72_v47  ;;  %v57_v52 = vld [vmem:[%s1136_s0 + $0x68] sm:$0xff]  ;;  %v75_v54 = vld [vmem:[%s1136_s0 + $0xf8] sm:$0xff]  ;;  %v58_v57 = vld [vmem:[%s1136_s0 + $0x70] sm:$0xff] }
   0xf   :  { %309 = vperm.xlu1 %760, %v40_v29   ;;  %v732_v55 = vpack.c.bf16 %v57_v52, %v56_v51  ;;  %v735_v56 = vpack.c.bf16 %v75_v54, %v74_v53  ;;  %v59_v58 = vld [vmem:[%s1136_s0 + $0x78] sm:$0xff]  ;;  %v27_v60 = vld [vmem:[%s1137_s1 + $0x8] sm:$0xff]  ;;  %v28_v61 = vld [vmem:[%s1137_s1 + $0x10] sm:$0xff] }
  0x10   :  { %v738_v59 = vpack.c.bf16 %v59_v58, %v58_v57  ;;  %v29_v62 = vld [vmem:[%s1137_s1 + $0x18] sm:$0xff]  ;;  %v30_v32 = vld [vmem:[%s1141_s3] sm:$0xff]  ;;  %v31_v33 = vld [vmem:[%s1141_s3 + $0x8] sm:$0xff] }
  0x12   :  { %314 = vperm.xlu0 %759, %v41_v34   ;;  %v32_v34 = vld [vmem:[%s1141_s3 + $0x10] sm:$0xff] }
  0x13   :  { %319 = vperm.xlu1 %760, %v42_v35   ;;  %v33_v35 = vld [vmem:[%s1141_s3 + $0x18] sm:$0xff] }
  0x15   :  { %710 = vmatpush3.bf16.xpose.msk.msra.mxu0 %vm811_vm1, %v708_v26 }
  0x16   :  { %713 = vmatprep.subr.msk.bf16.mxu0 %vm811_vm1, %v711_v27  ;;  %434 = vperm.xlu0 %759, %v43_v38  }
  0x1d   :  { %716 = vmatpush3.bf16.xpose.msk.msra.mxu0 %vm811_vm1, %v714_v36 }
  0x1e   :  { %719 = vmatprep.subr.msk.bf16.mxu0 %vm811_vm1, %v717_v37 }
  0x25   :  { %722 = vmatpush3.bf16.xpose.msk.msra.mxu0 %vm811_vm1, %v720_v43 }
  0x26   :  { %725 = vmatprep.subr.msk.bf16.mxu0 %vm811_vm1, %v723_v44 }
  0x2d   :  { %728 = vmatpush3.bf16.xpose.msk.msra.mxu0 %vm811_vm1, %v726_v49 }
  0x2e   :  { %731 = vmatprep.subr.msk.bf16.mxu0 %vm811_vm1, %v729_v50 }
  0x35   :  { %734 = vmatpush3.bf16.xpose.msk.msra.mxu0 %vm811_vm1, %v732_v55 }
  0x36   :  { %737 = vmatprep.subr.msk.bf16.mxu0 %vm811_vm1, %v735_v56 }
  0x3d   :  { %740 = vmatpush3.bf16.xpose.msk.msra.mxu0 %vm811_vm1, %v738_v59 }
  0x44   :  { %686 = vmatmul.mubr.msk.f32.vlgmr.msra.gmra.mrb[0].mxu0 %vm96_vm0, %v848_v17 }
  0x45   :  { %687 = vmatprep.mubr.msk.f32.mxu0 %vm96_vm0, %v27_v60 }
  0x48   :  { %688 = vmatmul.mubr.msk.f32.gmra.mrb[2].mxu0 %vm96_vm0, %v27_v60 }
  0x49   :  { %689 = vmatprep.mubr.msk.f32.mxu0 %vm96_vm0, %v28_v61 }
  0x4c   :  { %690 = vmatmul.mubr.msk.f32.gmra.mrb[4].mxu0 %vm96_vm0, %v28_v61 }
  0x4d   :  { %691 = vmatprep.mubr.msk.f32.mxu0 %vm96_vm0, %v29_v62 }
  0x50   :  { %692 = vmatmul.mubr.msk.f32.gmra.mrb[6].mxu0 %vm96_vm0, %v29_v62 }
  0x85   :  { %v79_v0 = vpop.permute.xlu0 %78 }
  0x86   :  { %v89_v9 = vpop.permute.xlu1 %88 }
  0x89   :  { %v84_v4 = vpop.permute.xlu0 %83 }
  0x8a   :  { %v94_v20 = vpop.permute.xlu1 %93 }
  0x8d   :  { %v305_v38 = vpop.permute.xlu0 %304 }
  0x8e   :  { %v310_v40 = vpop.permute.xlu1 %309 }
  0x91   :  { %v315_v53 = vpop.permute.xlu0 %314 }
  0x92   :  { %v320_v56 = vpop.permute.xlu1 %319 }
 0x117   :  { %v271_v1 = vpop.f32.mrb[0].mxu0 }
 0x118   :  { %v273_v2 = vpop.f32.mrb[1].mxu0  ;;  %v272_v3 = vadd.f32 %v271_v1, %v79_v0 }
 0x119   :  { %v274_v5 = vadd.f32 %v273_v2, %v79_v0 }
 0x11a   :  { %v294_v11 = vmax.f32 %v272_v3, 0.0 }
 0x11b   :  { %v277_v6 = vpop.f32.mrb[2].mxu0  ;;  %v295_v13 = vmax.f32 %v274_v5, 0.0  ;;  %v435_v5 = vpop.permute.xlu0 %434 }
 0x11c   :  { %v278_v7 = vadd.f32 %v277_v6, %v84_v4  ;;  %v279_v8 = vpop.f32.mrb[3].mxu0 }
 0x11d   :  { %v280_v10 = vadd.f32 %v279_v8, %v84_v4  ;;  %v34_v4 = vld [vmem:[%s1142_s5] sm:$0xff] }
 0x11e   :  { %v296_v12 = vmax.f32 %v278_v7, 0.0 }
 0x11f   :  { %v297_v14 = vmax.f32 %v280_v10, 0.0  ;;  %v283_v15 = vpop.f32.mrb[4].mxu0 }
 0x120   :  { %v285_v16 = vpop.f32.mrb[5].mxu0  ;;  %v743_v17 = vpack.c.bf16 %v296_v12, %v294_v11  ;;  %v284_v19 = vadd.f32 %v283_v15, %v89_v9 }
 0x121   :  { %v741_v18 = vpack.c.bf16 %v297_v14, %v295_v13  ;;  %v286_v21 = vadd.f32 %v285_v16, %v89_v9 }
 0x122   :  { %v298_v26 = vmax.f32 %v284_v19, 0.0 }
 0x123   :  { %v289_v22 = vpop.f32.mrb[6].mxu0  ;;  %742 = vmatprep.subr.bf16.mxu1 %v741_v18  ;;  %v299_v28 = vmax.f32 %v286_v21, 0.0 }
 0x124   :  { %v290_v23 = vadd.f32 %v289_v22, %v94_v20  ;;  %v291_v24 = vpop.f32.mrb[7].mxu0  ;;  %744 = vmatpush1.bf16.msra.mxu1 %v743_v17 }
 0x125   :  { %v292_v25 = vadd.f32 %v291_v24, %v94_v20 }
 0x126   :  { %v300_v27 = vmax.f32 %v290_v23, 0.0 }
 0x127   :  { %v301_v29 = vmax.f32 %v292_v25, 0.0 }
 0x128   :  { %v747_v30 = vpack.c.bf16 %v300_v27, %v298_v26 }
 0x129   :  { %v745_v31 = vpack.c.bf16 %v301_v29, %v299_v28 }
 0x12b   :  { %746 = vmatprep.subr.bf16.mxu1 %v745_v31 }
 0x12c   :  { %748 = vmatpush1.bf16.msra.mxu1 %v747_v30 }
 0x12f   :  { %648 = vmatmul.mubr.msk.f32.vlgmr.msra.gmra.mrb[0].mxu1 %vm322_vm2, %v30_v32 }
 0x130   :  { %405 = vmatprep.mubr.f32.mxu1 %v762_v63 }
 0x133   :  { %649 = vmatmul.mubr.msk.f32.gmra.mrb[2].mxu1 %vm322_vm2, %v31_v33 }
 0x134   :  { %411 = vmatprep.mubr.f32.mxu1 %v762_v63 }
 0x137   :  { %650 = vmatmul.mubr.msk.f32.gmra.mrb[4].mxu1 %vm322_vm2, %v32_v34 }
 0x138   :  { %417 = vmatprep.mubr.f32.mxu1 %v762_v63 }
 0x13b   :  { %651 = vmatmul.mubr.msk.f32.gmra.mrb[6].mxu1 %vm322_vm2, %v33_v35 }
 0x13c   :  { %504 = vmatprep.mubr.f32.mxu1 %v762_v63 }
 0x202   :  { %v401_v36 = vpop.f32.mrb[0].mxu1 }
 0x203   :  { %v403_v37 = vpop.f32.mrb[1].mxu1  ;;  %v402_v39 = vadd.f32 %v401_v36, %v305_v38 }
 0x204   :  { %v404_v41 = vadd.f32 %v403_v37, %v305_v38 }
 0x205   :  { %v424_v46 = vmax.f32 %v402_v39, 0.0 }
 0x206   :  { %v407_v42 = vpop.f32.mrb[2].mxu1  ;;  %v425_v48 = vmax.f32 %v404_v41, 0.0 }
 0x207   :  { %v408_v43 = vadd.f32 %v407_v42, %v310_v40  ;;  %v409_v44 = vpop.f32.mrb[3].mxu1 }
 0x208   :  { %v410_v45 = vadd.f32 %v409_v44, %v310_v40 }
 0x209   :  { %v426_v47 = vmax.f32 %v408_v43, 0.0 }
 0x20a   :  { %v427_v49 = vmax.f32 %v410_v45, 0.0  ;;  %v413_v50 = vpop.f32.mrb[4].mxu1 }
 0x20b   :  { %v751_v51 = vpack.c.bf16 %v426_v47, %v424_v46  ;;  %v415_v52 = vpop.f32.mrb[5].mxu1  ;;  %v414_v55 = vadd.f32 %v413_v50, %v315_v53 }
 0x20c   :  { %v749_v54 = vpack.c.bf16 %v427_v49, %v425_v48  ;;  %v416_v57 = vadd.f32 %v415_v52, %v315_v53 }
 0x20d   :  { %v428_v62 = vmax.f32 %v414_v55, 0.0 }
 0x20e   :  { %v419_v58 = vpop.f32.mrb[6].mxu1  ;;  %750 = vmatprep.subr.bf16.mxu1 %v749_v54  ;;  %v429_v0 = vmax.f32 %v416_v57, 0.0 }
 0x20f   :  { %v420_v59 = vadd.f32 %v419_v58, %v320_v56  ;;  %v421_v60 = vpop.f32.mrb[7].mxu1  ;;  %752 = vmatpush1.bf16.msra.mxu1 %v751_v51 }
 0x210   :  { %v422_v61 = vadd.f32 %v421_v60, %v320_v56 }
 0x211   :  { %v430_v63 = vmax.f32 %v420_v59, 0.0 }
 0x212   :  { %v431_v1 = vmax.f32 %v422_v61, 0.0 }
 0x213   :  { %v755_v2 = vpack.c.bf16 %v430_v63, %v428_v62 }
 0x214   :  { %v753_v3 = vpack.c.bf16 %v431_v1, %v429_v0 }
 0x216   :  { %754 = vmatprep.subr.bf16.mxu1 %v753_v3 }
 0x217   :  { %756 = vmatpush1.bf16.msra.mxu1 %v755_v2 }
 0x21a   :  { %652 = vmatmul.mubr.msk.f32.vlgmr.msra.gmra.mrb[8].mxu1 %vm322_vm2, %v34_v4 }
 0x2ed   :  { %v506_v6 = vpop.f32.mrb[8].mxu1 }
 0x2ee   :  { %v507_v7 = vadd.f32 %v506_v6, %v435_v5  ;;  %v508_v8 = vpop.f32.mrb[9].mxu1 }
 0x2ef   :  { %v509_v9 = vadd.f32 %v508_v8, %v435_v5 }
 0x2f0   :  { %511 = vxpose.xlu1.b32.start.end [1/1] (short) %v507_v7, 128 }
 0x2f1   :  { %543 = vxpose.xlu0.b32.start.end [1/1] (short) %v509_v9, 128 }
 0x370   :  { %v527_v10 = vpop.trf.xlu1 }
 0x371   :  { %v559_v11 = vpop.trf.xlu0  ;;  %576 = vst.msk [vmem:[%s1143_s7] sm:$0xff] %vm575_vm3, %v527_v10 }
 0x372   :  { %592 = vst.msk [vmem:[%s1143_s7 + $0x80] sm:$0xff] %vm575_vm3, %v559_v11 }
 0x374   :  { %v528_v12 = vpop.trf.xlu1 }
 0x375   :  { %v560_v13 = vpop.trf.xlu0  ;;  %577 = vst.msk [vmem:[%s1143_s7 + $0x8] sm:$0xff] %vm575_vm3, %v528_v12 }
 0x376   :  { %593 = vst.msk [vmem:[%s1143_s7 + $0x88] sm:$0xff] %vm575_vm3, %v560_v13 }
 0x378   :  { %v529_v14 = vpop.trf.xlu1 }
 0x379   :  { %v561_v15 = vpop.trf.xlu0  ;;  %578 = vst.msk [vmem:[%s1143_s7 + $0x10] sm:$0xff] %vm575_vm3, %v529_v14 }
 0x37a   :  { %594 = vst.msk [vmem:[%s1143_s7 + $0x90] sm:$0xff] %vm575_vm3, %v561_v15 }
 0x37c   :  { %v530_v16 = vpop.trf.xlu1 }
 0x37d   :  { %v562_v17 = vpop.trf.xlu0  ;;  %579 = vst.msk [vmem:[%s1143_s7 + $0x18] sm:$0xff] %vm575_vm3, %v530_v16 }
 0x37e   :  { %595 = vst.msk [vmem:[%s1143_s7 + $0x98] sm:$0xff] %vm575_vm3, %v562_v17 }
 0x380   :  { %v531_v18 = vpop.trf.xlu1 }
 0x381   :  { %v563_v19 = vpop.trf.xlu0  ;;  %580 = vst.msk [vmem:[%s1143_s7 + $0x20] sm:$0xff] %vm575_vm3, %v531_v18 }
 0x382   :  { %596 = vst.msk [vmem:[%s1143_s7 + $0xa0] sm:$0xff] %vm575_vm3, %v563_v19 }
 0x384   :  { %v532_v20 = vpop.trf.xlu1 }
 0x385   :  { %v564_v21 = vpop.trf.xlu0  ;;  %581 = vst.msk [vmem:[%s1143_s7 + $0x28] sm:$0xff] %vm575_vm3, %v532_v20 }
 0x386   :  { %597 = vst.msk [vmem:[%s1143_s7 + $0xa8] sm:$0xff] %vm575_vm3, %v564_v21 }
 0x388   :  { %v533_v22 = vpop.trf.xlu1 }
 0x389   :  { %v565_v23 = vpop.trf.xlu0  ;;  %582 = vst.msk [vmem:[%s1143_s7 + $0x30] sm:$0xff] %vm575_vm3, %v533_v22 }
 0x38a   :  { %598 = vst.msk [vmem:[%s1143_s7 + $0xb0] sm:$0xff] %vm575_vm3, %v565_v23 }
 0x38c   :  { %v534_v24 = vpop.trf.xlu1 }
 0x38d   :  { %v566_v25 = vpop.trf.xlu0  ;;  %583 = vst.msk [vmem:[%s1143_s7 + $0x38] sm:$0xff] %vm575_vm3, %v534_v24 }
 0x38e   :  { %599 = vst.msk [vmem:[%s1143_s7 + $0xb8] sm:$0xff] %vm575_vm3, %v566_v25 }
 0x390   :  { %v535_v26 = vpop.trf.xlu1 }
 0x391   :  { %v567_v27 = vpop.trf.xlu0  ;;  %584 = vst.msk [vmem:[%s1143_s7 + $0x40] sm:$0xff] %vm575_vm3, %v535_v26 }
 0x392   :  { %600 = vst.msk [vmem:[%s1143_s7 + $0xc0] sm:$0xff] %vm575_vm3, %v567_v27 }
 0x394   :  { %v536_v28 = vpop.trf.xlu1 }
 0x395   :  { %v568_v29 = vpop.trf.xlu0  ;;  %585 = vst.msk [vmem:[%s1143_s7 + $0x48] sm:$0xff] %vm575_vm3, %v536_v28 }
 0x396   :  { %601 = vst.msk [vmem:[%s1143_s7 + $0xc8] sm:$0xff] %vm575_vm3, %v568_v29 }
 0x398   :  { %v537_v30 = vpop.trf.xlu1 }
 0x399   :  { %v569_v31 = vpop.trf.xlu0  ;;  %586 = vst.msk [vmem:[%s1143_s7 + $0x50] sm:$0xff] %vm575_vm3, %v537_v30 }
 0x39a   :  { %602 = vst.msk [vmem:[%s1143_s7 + $0xd0] sm:$0xff] %vm575_vm3, %v569_v31 }
 0x39c   :  { %v538_v32 = vpop.trf.xlu1 }
 0x39d   :  { %v570_v33 = vpop.trf.xlu0  ;;  %587 = vst.msk [vmem:[%s1143_s7 + $0x58] sm:$0xff] %vm575_vm3, %v538_v32 }
 0x39e   :  { %603 = vst.msk [vmem:[%s1143_s7 + $0xd8] sm:$0xff] %vm575_vm3, %v570_v33 }
 0x3a0   :  { %v539_v34 = vpop.trf.xlu1 }
 0x3a1   :  { %v571_v35 = vpop.trf.xlu0  ;;  %588 = vst.msk [vmem:[%s1143_s7 + $0x60] sm:$0xff] %vm575_vm3, %v539_v34 }
 0x3a2   :  { %604 = vst.msk [vmem:[%s1143_s7 + $0xe0] sm:$0xff] %vm575_vm3, %v571_v35 }
 0x3a4   :  { %v540_v36 = vpop.trf.xlu1 }
 0x3a5   :  { %v572_v37 = vpop.trf.xlu0  ;;  %589 = vst.msk [vmem:[%s1143_s7 + $0x68] sm:$0xff] %vm575_vm3, %v540_v36 }
 0x3a6   :  { %605 = vst.msk [vmem:[%s1143_s7 + $0xe8] sm:$0xff] %vm575_vm3, %v572_v37 }
 0x3a8   :  { %v541_v38 = vpop.trf.xlu1 }
 0x3a9   :  { %v573_v39 = vpop.trf.xlu0  ;;  %590 = vst.msk [vmem:[%s1143_s7 + $0x70] sm:$0xff] %vm575_vm3, %v541_v38 }
 0x3aa   :  { %606 = vst.msk [vmem:[%s1143_s7 + $0xf0] sm:$0xff] %vm575_vm3, %v573_v39 }
 0x3ac   :  { %v542_v40 = vpop.trf.xlu1 }
 0x3ad   :  { %v574_v41 = vpop.trf.xlu0  ;;  %591 = vst.msk [vmem:[%s1143_s7 + $0x78] sm:$0xff] %vm575_vm3, %v542_v40 }
 0x3ae   :  { %607 = vst.msk [vmem:[%s1143_s7 + $0xf8] sm:$0xff] %vm575_vm3, %v574_v41 }

</bundles_post_ra>
